<compile_context>
chip_gen: v5e
topology: v5e:2x2
jax: 0.10.0
libtpu: 0.0.40
codegen_flags: <defaults>
</compile_context>

<pallas_src>
import jax
import jax.numpy as jnp
from jax.experimental import pallas as pl
from jax.experimental.pallas import tpu as pltpu


def _round_up(x, m):
    return ((x + m - 1) // m) * m


def critic_kernel(x_ref,
                  w1_ref, b1_ref,
                  w2_ref, b2_ref,
                  w3_ref, b3_ref,
                  w4_ref, b4_ref,
                  out_ref):
    # fc1 + ReLU (bf16 MXU matmul, f32 accumulation; elementwise stays f32)
    x = x_ref[...].astype(jnp.bfloat16)
    h = jnp.dot(x, w1_ref[...], preferred_element_type=jnp.float32)
    h = jnp.maximum(h + b1_ref[...], 0.0)

    # fc2 + ReLU
    h = jnp.dot(h.astype(jnp.bfloat16), w2_ref[...],
                preferred_element_type=jnp.float32)
    h = jnp.maximum(h + b2_ref[...], 0.0)

    # fc3 + ReLU
    h = jnp.dot(h.astype(jnp.bfloat16), w3_ref[...],
                preferred_element_type=jnp.float32)
    h = jnp.maximum(h + b3_ref[...], 0.0)

    # fc4 (out_features = 1): VPU multiply + cross-lane reduce instead of an
    # N=1 MXU pass; w4 is a resident (1, 64) f32 row, b4 a scalar in SMEM.
    out = jnp.sum(h * w4_ref[...], axis=-1, keepdims=True) + b4_ref[0]
    out_ref[...] = out.astype(out_ref.dtype)


def critic_forward(state, params, *, tb=256):
    """state: (B, state_size) f32.  Returns (B, 1) f32."""
    B, S = state.shape
    # Don't over-pad tiny batches, but keep TB a multiple of 128 for the MXU.
    tb = min(tb, _round_up(max(B, 1), 128))
    B_pad = _round_up(B, tb)
    if B_pad != B:
        state = jnp.pad(state, ((0, B_pad - B), (0, 0)))
    num_tiles = B_pad // tb

    w1, b1 = params["w1"], params["b1"]
    w2, b2 = params["w2"], params["b2"]
    w3, b3 = params["w3"], params["b3"]
    w4, b4 = params["w4"], params["b4"]

    def resident(shape):
        # Constant block index -> copied into VMEM once, resident for all tiles.
        return pl.BlockSpec(shape, lambda i: (0, 0))

    out = pl.pallas_call(
        critic_kernel,
        out_shape=jax.ShapeDtypeStruct((B_pad, 1), jnp.float32),
        grid=(num_tiles,),
        in_specs=[
            pl.BlockSpec((tb, S), lambda i: (i, 0)),            # state tile
            resident(w1.shape), resident(b1.shape),             # fc1
            resident(w2.shape), resident(b2.shape),             # fc2
            resident(w3.shape), resident(b3.shape),             # fc3
            resident(w4.shape),                                 # fc4 weight row
            pl.BlockSpec(memory_space=pltpu.MemorySpace.SMEM),  # fc4 scalar bias
        ],
        out_specs=pl.BlockSpec((tb, 1), lambda i: (i, 0)),
        compiler_params=pltpu.CompilerParams(
            dimension_semantics=("parallel",)),  # shard batch tiles across TCs
    )(state, w1, b1, w2, b2, w3, b3, w4, b4)
    return out[:B]


def xavier_uniform(key, fan_in, fan_out, dtype=jnp.float32):
    # matches torch.nn.init.xavier_uniform_: bound = sqrt(6 / (fan_in + fan_out))
    bound = (6.0 / (fan_in + fan_out)) ** 0.5
    return jax.random.uniform(key, (fan_in, fan_out), dtype,
                              minval=-bound, maxval=bound)


def init_params(key, state_size):
    dims = [(state_size, 512), (512, 128), (128, 64), (64, 1)]
    keys = jax.random.split(key, 2 * len(dims))
    params = {}
    # fc1..fc3: bf16 weights (MXU-native), f32 biases (small random values so
    # the bias path is actually exercised by the numeric check).
    for i in range(3):
        fi, fo = dims[i]
        params[f"w{i+1}"] = xavier_uniform(keys[2 * i], fi, fo).astype(jnp.bfloat16)
        params[f"b{i+1}"] = jax.random.uniform(keys[2 * i + 1], (1, fo),
                                               jnp.float32, -0.05, 0.05)
    # fc4: f32, stored as a (1, 64) row for the VPU reduction; scalar bias (SMEM).
    w4 = xavier_uniform(keys[6], 64, 1)                      # (64, 1)
    params["w4"] = w4.reshape(1, 64)                         # row vector
    params["b4"] = jax.random.uniform(keys[7], (1,), jnp.float32, -0.05, 0.05)
    return params


def reference_forward(state, params):
    """Pure-JAX reference with identical precision policy (bf16 dots, f32 accum)."""
    def ff(x, w, b):
        y = jnp.dot(x.astype(jnp.bfloat16), w, preferred_element_type=jnp.float32)
        return jnp.maximum(y + b, 0.0)
    h = ff(state, params["w1"], params["b1"])
    h = ff(h, params["w2"], params["b2"])
    h = ff(h, params["w3"], params["b3"])
    return jnp.sum(h * params["w4"], axis=-1, keepdims=True) + params["b4"]


if __name__ == "__main__":
    key = jax.random.PRNGKey(0)
    k_state, k_params = jax.random.split(key)

    batch = 8
    state_size = 8  # e.g. LunarLander observation dim
    state = jax.random.normal(k_state, (batch, state_size), jnp.float32)
    params = init_params(k_params, state_size)

    out = jax.block_until_ready(critic_forward(state, params))
    ref = reference_forward(state, params)

    assert out.shape == (batch, 1)
    max_err = float(jnp.max(jnp.abs(out - ref)))
    assert jnp.allclose(out, ref, atol=1e-3, rtol=1e-3), f"mismatch, max err {max_err}"
    print("KERNEL_OK")
</pallas_src>

<mosaic_0001>
module attributes {stable_mosaic.version = 11 : i64} {
  func.func @critic_kernel(%arg0: i32, %arg1: memref<128x8xf32, #tpu.memory_space<vmem>>, %arg2: memref<8x512xbf16, #tpu.memory_space<vmem>>, %arg3: memref<1x512xf32, #tpu.memory_space<vmem>>, %arg4: memref<512x128xbf16, #tpu.memory_space<vmem>>, %arg5: memref<1x128xf32, #tpu.memory_space<vmem>>, %arg6: memref<128x64xbf16, #tpu.memory_space<vmem>>, %arg7: memref<1x64xf32, #tpu.memory_space<vmem>>, %arg8: memref<1x64xf32, #tpu.memory_space<vmem>>, %arg9: memref<1xf32, #tpu.memory_space<smem>>, %arg10: memref<128x1xf32, #tpu.memory_space<vmem>>) attributes {dimension_semantics = [#tpu.dimension_semantics<parallel>], iteration_bounds = array<i64: 1>, scalar_prefetch = 0 : i64, scratch_operands = 0 : i64, tpu.core_type = #tpu.core_type<tc>, window_params = [{transform_indices = @transform_0, window_bounds = array<i64: 128, 8>}, {pipeline_mode = #tpu.pipeline_mode<synchronous>, transform_indices = @transform_1, window_bounds = array<i64: 8, 512>}, {pipeline_mode = #tpu.pipeline_mode<synchronous>, transform_indices = @transform_2, window_bounds = array<i64: 1, 512>}, {pipeline_mode = #tpu.pipeline_mode<synchronous>, transform_indices = @transform_3, window_bounds = array<i64: 512, 128>}, {pipeline_mode = #tpu.pipeline_mode<synchronous>, transform_indices = @transform_4, window_bounds = array<i64: 1, 128>}, {pipeline_mode = #tpu.pipeline_mode<synchronous>, transform_indices = @transform_5, window_bounds = array<i64: 128, 64>}, {pipeline_mode = #tpu.pipeline_mode<synchronous>, transform_indices = @transform_6, window_bounds = array<i64: 1, 64>}, {pipeline_mode = #tpu.pipeline_mode<synchronous>, transform_indices = @transform_7, window_bounds = array<i64: 1, 64>}, {transform_indices = @transform_8, window_bounds = array<i64: 1>}, {transform_indices = @transform_9, window_bounds = array<i64: 128, 1>}]} {
    %c0 = arith.constant 0 : index
    %c0_0 = arith.constant 0 : index
    %0 = vector.load %arg1[%c0, %c0_0] : memref<128x8xf32, #tpu.memory_space<vmem>>, vector<128x8xf32>
    %1 = arith.truncf %0 : vector<128x8xf32> to vector<128x8xbf16>
    %c0_1 = arith.constant 0 : index
    %c0_2 = arith.constant 0 : index
    %2 = vector.load %arg2[%c0_1, %c0_2] : memref<8x512xbf16, #tpu.memory_space<vmem>>, vector<8x512xbf16>
    %cst = arith.constant dense<0.000000e+00> : vector<128x512xf32>
    %3 = tpu.matmul %1, %2, %cst {dimension_numbers = #tpu.dot_dimension_numbers<[1], [0], [0], [1], [0, 0, 1, 1], [], []>} : vector<128x8xbf16>, vector<8x512xbf16>, vector<128x512xf32> -> vector<128x512xf32>
    %c0_3 = arith.constant 0 : index
    %c0_4 = arith.constant 0 : index
    %4 = vector.load %arg3[%c0_3, %c0_4] : memref<1x512xf32, #tpu.memory_space<vmem>>, vector<1x512xf32>
    %5 = vector.broadcast %4 : vector<1x512xf32> to vector<128x512xf32>
    %6 = arith.addf %3, %5 : vector<128x512xf32>
    %cst_5 = arith.constant 0.000000e+00 : f32
    %7 = vector.broadcast %cst_5 : f32 to vector<128x512xf32>
    %8 = arith.maximumf %6, %7 : vector<128x512xf32>
    %9 = arith.truncf %8 : vector<128x512xf32> to vector<128x512xbf16>
    %c0_6 = arith.constant 0 : index
    %c0_7 = arith.constant 0 : index
    %10 = vector.load %arg4[%c0_6, %c0_7] : memref<512x128xbf16, #tpu.memory_space<vmem>>, vector<512x128xbf16>
    %cst_8 = arith.constant dense<0.000000e+00> : vector<128x128xf32>
    %11 = tpu.matmul %9, %10, %cst_8 {dimension_numbers = #tpu.dot_dimension_numbers<[1], [0], [0], [1], [0, 0, 1, 1], [], []>} : vector<128x512xbf16>, vector<512x128xbf16>, vector<128x128xf32> -> vector<128x128xf32>
    %c0_9 = arith.constant 0 : index
    %c0_10 = arith.constant 0 : index
    %12 = vector.load %arg5[%c0_9, %c0_10] : memref<1x128xf32, #tpu.memory_space<vmem>>, vector<1x128xf32>
    %13 = vector.broadcast %12 : vector<1x128xf32> to vector<128x128xf32>
    %14 = arith.addf %11, %13 : vector<128x128xf32>
    %cst_11 = arith.constant 0.000000e+00 : f32
    %15 = vector.broadcast %cst_11 : f32 to vector<128x128xf32>
    %16 = arith.maximumf %14, %15 : vector<128x128xf32>
    %17 = arith.truncf %16 : vector<128x128xf32> to vector<128x128xbf16>
    %c0_12 = arith.constant 0 : index
    %c0_13 = arith.constant 0 : index
    %18 = vector.load %arg6[%c0_12, %c0_13] : memref<128x64xbf16, #tpu.memory_space<vmem>>, vector<128x64xbf16>
    %cst_14 = arith.constant dense<0.000000e+00> : vector<128x64xf32>
    %19 = tpu.matmul %17, %18, %cst_14 {dimension_numbers = #tpu.dot_dimension_numbers<[1], [0], [0], [1], [0, 0, 1, 1], [], []>} : vector<128x128xbf16>, vector<128x64xbf16>, vector<128x64xf32> -> vector<128x64xf32>
    %c0_15 = arith.constant 0 : index
    %c0_16 = arith.constant 0 : index
    %20 = vector.load %arg7[%c0_15, %c0_16] : memref<1x64xf32, #tpu.memory_space<vmem>>, vector<1x64xf32>
    %21 = vector.broadcast %20 : vector<1x64xf32> to vector<128x64xf32>
    %22 = arith.addf %19, %21 : vector<128x64xf32>
    %cst_17 = arith.constant 0.000000e+00 : f32
    %23 = vector.broadcast %cst_17 : f32 to vector<128x64xf32>
    %24 = arith.maximumf %22, %23 : vector<128x64xf32>
    %c0_18 = arith.constant 0 : index
    %c0_19 = arith.constant 0 : index
    %25 = vector.load %arg8[%c0_18, %c0_19] : memref<1x64xf32, #tpu.memory_space<vmem>>, vector<1x64xf32>
    %26 = vector.broadcast %25 : vector<1x64xf32> to vector<128x64xf32>
    %27 = arith.mulf %24, %26 : vector<128x64xf32>
    %cst_20 = arith.constant dense<0.000000e+00> : vector<128xf32>
    %28 = vector.multi_reduction <add>, %27, %cst_20 [1] : vector<128x64xf32> to vector<128xf32>
    %29 = vector.shape_cast %28 : vector<128xf32> to vector<128x1xf32>
    %c0_21 = arith.constant 0 : index
    %30 = memref.load %arg9[%c0_21] : memref<1xf32, #tpu.memory_space<smem>>
    %31 = vector.broadcast %30 : f32 to vector<128x1xf32>
    %32 = arith.addf %29, %31 : vector<128x1xf32>
    %c0_22 = arith.constant 0 : index
    %c0_23 = arith.constant 0 : index
    %33 = vector.load %arg10[%c0_22, %c0_23] : memref<128x1xf32, #tpu.memory_space<vmem>>, vector<128x1xf32>
    tpu.vector_store %arg10[%c0_22, %c0_23], %32 {strides = array<i32>} : memref<128x1xf32, #tpu.memory_space<vmem>>, vector<128x1xf32>,
    return
  }
  func.func @transform_0(%arg0: i32) -> (i32, i32) {
    %c0_i32 = arith.constant 0 : i32
    %c0_i32_0 = arith.constant 0 : i32
    return %arg0, %c0_i32 : i32, i32
  }
  func.func @transform_1(%arg0: i32) -> (i32, i32) {
    %c0_i32 = arith.constant 0 : i32
    %c0_i32_0 = arith.constant 0 : i32
    %c0_i32_1 = arith.constant 0 : i32
    return %c0_i32, %c0_i32_0 : i32, i32
  }
  func.func @transform_2(%arg0: i32) -> (i32, i32) {
    %c0_i32 = arith.constant 0 : i32
    %c0_i32_0 = arith.constant 0 : i32
    %c0_i32_1 = arith.constant 0 : i32
    return %c0_i32, %c0_i32_0 : i32, i32
  }
  func.func @transform_3(%arg0: i32) -> (i32, i32) {
    %c0_i32 = arith.constant 0 : i32
    %c0_i32_0 = arith.constant 0 : i32
    %c0_i32_1 = arith.constant 0 : i32
    return %c0_i32, %c0_i32_0 : i32, i32
  }
  func.func @transform_4(%arg0: i32) -> (i32, i32) {
    %c0_i32 = arith.constant 0 : i32
    %c0_i32_0 = arith.constant 0 : i32
    %c0_i32_1 = arith.constant 0 : i32
    return %c0_i32, %c0_i32_0 : i32, i32
  }
  func.func @transform_5(%arg0: i32) -> (i32, i32) {
    %c0_i32 = arith.constant 0 : i32
    %c0_i32_0 = arith.constant 0 : i32
    %c0_i32_1 = arith.constant 0 : i32
    return %c0_i32, %c0_i32_0 : i32, i32
  }
  func.func @transform_6(%arg0: i32) -> (i32, i32) {
    %c0_i32 = arith.constant 0 : i32
    %c0_i32_0 = arith.constant 0 : i32
    %c0_i32_1 = arith.constant 0 : i32
    return %c0_i32, %c0_i32_0 : i32, i32
  }
  func.func @transform_7(%arg0: i32) -> (i32, i32) {
    %c0_i32 = arith.constant 0 : i32
    %c0_i32_0 = arith.constant 0 : i32
    %c0_i32_1 = arith.constant 0 : i32
    return %c0_i32, %c0_i32_0 : i32, i32
  }
  func.func @transform_8(%arg0: i32) -> i32 {
    %c0_i32 = arith.constant 0 : i32
    %c0_i32_0 = arith.constant 0 : i32
    return %c0_i32 : i32
  }
  func.func @transform_9(%arg0: i32) -> (i32, i32) {
    %c0_i32 = arith.constant 0 : i32
    %c0_i32_0 = arith.constant 0 : i32
    return %arg0, %c0_i32 : i32, i32
  }
}

</mosaic_0001>

<bundles_post_ra>
// kernel: tpu_custom_call.1
= control target key start
LH: loop header
LB: loop body
LE: loop exit
PB: predicated region body
PF: predicated region fallthrough
CT: control target
= control target key end

     0   :  { %15 = vsyncpa [#allocation4], 0  ;;  %s1415_s12 = smov [#allocation3]   ;;  %s1416_s14 = smov 64   ;;  %s1851_s0 = inlined_call_operand.vmem [shape: f32[128,8], index: 0, kind: input, shape index: {}]   ;;  %s1852_s1 = inlined_call_operand.vmem [shape: bf16[8,512], index: 1, kind: input, shape index: {}]   ;;  %s1853_s2 = inlined_call_operand.vmem [shape: f32[1,512], index: 2, kind: input, shape index: {}]   ;;  %s1854_s3 = inlined_call_operand.hbm [shape: bf16[512,128], index: 3, kind: input, shape index: {}]   ;;  %s1855_s4 = inlined_call_operand.vmem [shape: f32[1,128], index: 4, kind: input, shape index: {}]   ;;  %s1856_s5 = inlined_call_operand.vmem [shape: bf16[128,64], index: 5, kind: input, shape index: {}]   ;;  %s1857_s6 = inlined_call_operand.vmem [shape: f32[1,64], index: 6, kind: input, shape index: {}]   ;;  %s1858_s7 = inlined_call_operand.vmem [shape: f32[1,64], index: 7, kind: input, shape index: {}]   ;;  %s1859_s8 = inlined_call_operand.<no memory space> [shape: f32[1], index: 8, kind: input, shape index: {}]   ;;  %s1860_s9 = inlined_call_operand.vmem [shape: f32[128,1], index: 9, kind: output, shape index: {}]  }
   0x1   :  { %s26_s11 = sshll.u32 %s1854_s3, 4  ;;  %s28_s13 = sshll.u32 %s1415_s12, 4  ;;  %s27_s11 = int_to_ptr.hbm [resolvable:$true] %s26_s11  ;;  %s29_s13 = int_to_ptr.vmem [resolvable:$true] %s28_s13 }
   0x2   :  { %s1417_s15 = smov 4  }
   0x3   :  { %34 = dma.hbm_to_vmem [thread:$0]  %s27_s11, 4096, %s29_s13, [#allocation4], %s1416_s14, %s1416_s14, %s1417_s15  }
   0x4   :  { %1413 = dma.done.wait [#allocation4], 4096  }
   0x5   :  { %1414 = vsyncadd [#allocation4], 4294963200  ;;  %v74_v0 = vld [vmem:[%s1852_s1] sm:$0xff]  ;;  %v51_v3 = vld [vmem:[%s1851_s0 + $0x8] sm:$0xff]  ;;  %vm121_vm0 = vcmask 1043456   ;;  %vm96_vm1 = vcmask 64512  }
   0x6   :  { %v88_v1 = vunpack.c.l.b16 %v74_v0  ;;  %v50_v2 = vld [vmem:[%s1851_s0] sm:$0xff]  ;;  %v89_v5 = vunpack.c.h.b16 %v74_v0  ;;  %v55_v6 = vld [vmem:[%s1851_s0 + $0x28] sm:$0xff]  ;;  %v52_v26 = vld [vmem:[%s1851_s0 + $0x10] sm:$0xff]  ;;  %vm1059_vm2 = vcmask 523264   ;;  %vm1126_vm3 = vcmask 7168  }
   0x7   :  { %v54_v4 = vld [vmem:[%s1851_s0 + $0x20] sm:$0xff]  ;;  %v59_v8 = vld [vmem:[%s1851_s0 + $0x48] sm:$0xff]  ;;  %v66_v14 = vpack.c.bf16 %v51_v3, %v50_v2  ;;  %v53_v27 = vld [vmem:[%s1851_s0 + $0x18] sm:$0xff] }
   0x8   :  { %v58_v7 = vld [vmem:[%s1851_s0 + $0x40] sm:$0xff]  ;;  %v92_v9 = vpack.c.b16 %v88_v1, %v88_v1  ;;  %v63_v11 = vld [vmem:[%s1851_s0 + $0x68] sm:$0xff]  ;;  %v93_v13 = vpack.c.b16 %v89_v5, %v89_v5  ;;  %v68_v18 = vpack.c.bf16 %v55_v6, %v54_v4  ;;  %v56_v28 = vld [vmem:[%s1851_s0 + $0x30] sm:$0xff]  ;;  %v67_v34 = vpack.c.bf16 %v53_v27, %v52_v26 }
   0x9   :  { %v62_v10 = vld [vmem:[%s1851_s0 + $0x60] sm:$0xff]  ;;  %v75_v12 = vld [vmem:[%s1852_s1 + $0x8] sm:$0xff]  ;;  %v1502_v19 = vpack.c.bf16 %v59_v8, %v58_v7  ;;  %v57_v29 = vld [vmem:[%s1851_s0 + $0x38] sm:$0xff] }
   0xa   :  { %v90_v15 = vunpack.c.l.b16 %v75_v12  ;;  %v91_v16 = vunpack.c.h.b16 %v75_v12  ;;  %v123_v17 = vsel %vm121_vm0, %v92_v9, 0  ;;  %v126_v20 = vsel %vm121_vm0, %v93_v13, 0  ;;  %v60_v30 = vld [vmem:[%s1851_s0 + $0x50] sm:$0xff]  ;;  %v61_v31 = vld [vmem:[%s1851_s0 + $0x58] sm:$0xff]  ;;  %v1361_v44 = vld [vmem:[#allocation3 + $0xa8] sm:$0xff] }
   0xb   :  { %141 = vmatpush.bf16.msra.mxu0 %v123_v17  ;;  %1380 = vmatpush.bf16.msra.mxu1 %v123_v17  ;;  %v1505_v21 = vpack.c.bf16 %v63_v11, %v62_v10  ;;  %v64_v32 = vld [vmem:[%s1851_s0 + $0x70] sm:$0xff]  ;;  %v65_v33 = vld [vmem:[%s1851_s0 + $0x78] sm:$0xff]  ;;  %v69_v35 = vpack.c.bf16 %v57_v29, %v56_v28  ;;  %v1539_v36 = vpack.c.bf16 %v61_v31, %v60_v30  ;;  %v1369_v45 = vld [vmem:[#allocation3 + $0xe8] sm:$0xff] }
   0xc   :  { %v94_v22 = vpack.c.b16 %v90_v15, %v90_v15  ;;  %v95_v23 = vpack.c.b16 %v91_v16, %v91_v16  ;;  %1381 = vmatpush.bf16.msra.mxu2 %v123_v17  ;;  %1382 = vmatpush.bf16.msra.mxu3 %v123_v17  ;;  %v1541_v37 = vpack.c.bf16 %v65_v33, %v64_v32  ;;  %v1363_v38 = vld [vmem:[#allocation3 + $0xb8] sm:$0xff]  ;;  %v1362_v41 = vld [vmem:[#allocation3 + $0xb0] sm:$0xff]  ;;  %v1353_v46 = vld [vmem:[#allocation3 + $0x68] sm:$0xff] }
   0xd   :  { %v1371_v39 = vld [vmem:[#allocation3 + $0xf8] sm:$0xff]  ;;  %v1370_v42 = vld [vmem:[#allocation3 + $0xf0] sm:$0xff]  ;;  %v1360_v47 = vld [vmem:[#allocation3 + $0xa0] sm:$0xff] }
   0xe   :  { %v129_v24 = vsel %vm121_vm0, %v94_v22, 0  ;;  %v132_v25 = vsel %vm121_vm0, %v95_v23, 0  ;;  %1148 = vmatmul.msk.bf16.vlgmr.msra.gmra.mxu0 %vm96_vm1, %v66_v14  ;;  %1150 = vmatmul.msk.bf16.vlgmr.msra.gmra.mxu1 %vm96_vm1, %v68_v18  ;;  %v1355_v40 = vld [vmem:[#allocation3 + $0x78] sm:$0xff]  ;;  %v1354_v43 = vld [vmem:[#allocation3 + $0x70] sm:$0xff]  ;;  %v1368_v48 = vld [vmem:[#allocation3 + $0xe0] sm:$0xff] }
   0xf   :  { %190 = vmatpush.bf16.msrb.mxu1 %v126_v20  ;;  %1152 = vmatmul.msk.bf16.vlgmr.msra.gmra.mxu2 %vm96_vm1, %v1502_v19  ;;  %v1352_v49 = vld [vmem:[#allocation3 + $0x60] sm:$0xff]  ;;  %v1347_v50 = vld [vmem:[#allocation3 + $0x38] sm:$0xff]  ;;  %v1346_v51 = vld [vmem:[#allocation3 + $0x30] sm:$0xff] }
  0x10   :  { %1154 = vmatmul.msk.bf16.vlgmr.msra.gmra.mxu3 %vm96_vm1, %v1505_v21  ;;  %239 = vmatpush.bf16.msrb.mxu2 %v129_v24  ;;  %v1359_v52 = vld [vmem:[#allocation3 + $0x98] sm:$0xff]  ;;  %v1345_v54 = vld [vmem:[#allocation3 + $0x28] sm:$0xff]  ;;  %v1344_v56 = vld [vmem:[#allocation3 + $0x20] sm:$0xff] }
  0x11   :  { %288 = vmatpush.bf16.msrb.mxu3 %v132_v25  ;;  %686 = vmatpush.bf16.msrb.mxu0 %v1347_v50  ;;  %v1367_v53 = vld [vmem:[#allocation3 + $0xd8] sm:$0xff]  ;;  %v1342_v58 = vld [vmem:[#allocation3 + $0x10] sm:$0xff]  ;;  %v1341_v60 = vld [vmem:[#allocation3 + $0x8] sm:$0xff] }
  0x12   :  { %v1351_v55 = vld [vmem:[#allocation3 + $0x58] sm:$0xff]  ;;  %v1358_v59 = vld [vmem:[#allocation3 + $0x90] sm:$0xff]  ;;  %v1340_v63 = vld [vmem:[#allocation3] sm:$0xff] }
  0x13   :  { %735 = vmatpush.bf16.msra.mxu1 %v1355_v40  ;;  %v1343_v57 = vld [vmem:[#allocation3 + $0x18] sm:$0xff]  ;;  %v1366_v61 = vld [vmem:[#allocation3 + $0xd0] sm:$0xff]  ;;  %v1357_v0 = vld [vmem:[#allocation3 + $0x88] sm:$0xff] }
  0x14   :  { %784 = vmatpush.bf16.msra.mxu2 %v1363_v38  ;;  %v1350_v62 = vld [vmem:[#allocation3 + $0x50] sm:$0xff]  ;;  %v1365_v1 = vld [vmem:[#allocation3 + $0xc8] sm:$0xff]  ;;  %v1576_v3 = vld [vmem:[%s1853_s2] sm:$0xf] }
  0x15   :  { %833 = vmatpush.bf16.msra.mxu3 %v1371_v39  ;;  %687 = vmatpush.bf16.msrb.mxu0 %v1346_v51  ;;  %v1349_v2 = vld [vmem:[#allocation3 + $0x48] sm:$0xff]  ;;  %v1579_v6 = vperm.slane %v1576_v3, 0  ;;  %v1356_v7 = vld [vmem:[#allocation3 + $0x80] sm:$0xff] }
  0x16   :  { %v1364_v17 = vld [vmem:[#allocation3 + $0xc0] sm:$0xff] }
  0x17   :  { %736 = vmatpush.bf16.msra.mxu1 %v1354_v43 }
  0x18   :  { %785 = vmatpush.bf16.msra.mxu2 %v1362_v41 }
  0x19   :  { %834 = vmatpush.bf16.msra.mxu3 %v1370_v42  ;;  %688 = vmatpush.bf16.msrb.mxu0 %v1345_v54 }
  0x1b   :  { %737 = vmatpush.bf16.msra.mxu1 %v1353_v46 }
  0x1c   :  { %786 = vmatpush.bf16.msra.mxu2 %v1361_v44 }
  0x1d   :  { %835 = vmatpush.bf16.msra.mxu3 %v1369_v45  ;;  %689 = vmatpush.bf16.msrb.mxu0 %v1344_v56 }
  0x1e   :  { %1149 = vmatmul.msk.bf16.gmra.mxu0 %vm96_vm1, %v67_v34  ;;  %1151 = vmatmul.msk.bf16.gmra.mxu1 %vm96_vm1, %v69_v35 }
  0x1f   :  { %1153 = vmatmul.msk.bf16.gmra.mxu2 %vm96_vm1, %v1539_v36  ;;  %738 = vmatpush.bf16.msra.mxu1 %v1352_v49  ;;  %v1612_v49 = vperm.slane %v1576_v3, 1 }
  0x20   :  { %1155 = vmatmul.msk.bf16.gmra.mxu3 %vm96_vm1, %v1541_v37  ;;  %787 = vmatpush.bf16.msra.mxu2 %v1360_v47 }
  0x21   :  { %836 = vmatpush.bf16.msra.mxu3 %v1368_v48  ;;  %690 = vmatpush.bf16.msrb.mxu0 %v1343_v57 }
  0x23   :  { %739 = vmatpush.bf16.msra.mxu1 %v1351_v55 }
  0x24   :  { %788 = vmatpush.bf16.msra.mxu2 %v1359_v52 }
  0x25   :  { %837 = vmatpush.bf16.msra.mxu3 %v1367_v53  ;;  %691 = vmatpush.bf16.msrb.mxu0 %v1342_v58 }
  0x27   :  { %740 = vmatpush.bf16.msra.mxu1 %v1350_v62 }
  0x28   :  { %789 = vmatpush.bf16.msra.mxu2 %v1358_v59 }
  0x29   :  { %692 = vmatpush.bf16.msrb.mxu0 %v1341_v60  ;;  %838 = vmatpush.bf16.msra.mxu3 %v1366_v61 }
  0x2b   :  { %741 = vmatpush.bf16.msra.mxu1 %v1349_v2  ;;  %v1623_v2 = vperm.slane %v1576_v3, 2 }
  0x2c   :  { %790 = vmatpush.bf16.msra.mxu2 %v1357_v0 }
  0x2d   :  { %693 = vmatpush.bf16.msrb.mxu0 %v1340_v63  ;;  %839 = vmatpush.bf16.msra.mxu3 %v1365_v1 }
  0x2e   :  { %1156 = vmatmul.msk.bf16.vlgmr.msrb.gmra.mxu1 %vm96_vm1, %v66_v14 }
  0x2f   :  { %1164 = vmatmul.msk.bf16.vlgmr.msrb.gmra.mxu2 %vm96_vm1, %v66_v14 }
  0x30   :  { %1172 = vmatmul.msk.bf16.vlgmr.msrb.gmra.mxu3 %vm96_vm1, %v66_v14  ;;  %791 = vmatpush.bf16.msra.mxu2 %v1356_v7 }
  0x31   :  { %840 = vmatpush.bf16.msra.mxu3 %v1364_v17 }
  0x3e   :  { %1157 = vmatmul.msk.bf16.gmra.mxu1 %vm96_vm1, %v67_v34 }
  0x3f   :  { %1165 = vmatmul.msk.bf16.gmra.mxu2 %vm96_vm1, %v67_v34 }
  0x40   :  { %1173 = vmatmul.msk.bf16.gmra.mxu3 %vm96_vm1, %v67_v34 }
  0x4e   :  { %1158 = vmatmul.msk.bf16.gmra.mxu1 %vm96_vm1, %v68_v18 }
  0x4f   :  { %1166 = vmatmul.msk.bf16.gmra.mxu2 %vm96_vm1, %v68_v18 }
  0x50   :  { %1174 = vmatmul.msk.bf16.gmra.mxu3 %vm96_vm1, %v68_v18 }
  0x5e   :  { %1159 = vmatmul.msk.bf16.gmra.mxu1 %vm96_vm1, %v69_v35 }
  0x5f   :  { %1167 = vmatmul.msk.bf16.gmra.mxu2 %vm96_vm1, %v69_v35 }
  0x60   :  { %1175 = vmatmul.msk.bf16.gmra.mxu3 %vm96_vm1, %v69_v35 }
  0x6e   :  { %1160 = vmatmul.msk.bf16.gmra.mxu1 %vm96_vm1, %v1502_v19 }
  0x6f   :  { %1168 = vmatmul.msk.bf16.gmra.mxu2 %vm96_vm1, %v1502_v19 }
  0x70   :  { %1176 = vmatmul.msk.bf16.gmra.mxu3 %vm96_vm1, %v1502_v19  ;;  %v1348_v19 = vld [vmem:[#allocation3 + $0x40] sm:$0xff] }
  0x71   :  { %742 = vmatpush.bf16.msra.mxu1 %v1348_v19 }
  0x7e   :  { %1161 = vmatmul.msk.bf16.gmra.mxu1 %vm96_vm1, %v1539_v36 }
  0x7f   :  { %1169 = vmatmul.msk.bf16.gmra.mxu2 %vm96_vm1, %v1539_v36 }
  0x80   :  { %1177 = vmatmul.msk.bf16.gmra.mxu3 %vm96_vm1, %v1539_v36 }
  0x8b   :  { %v143_v4 = vpop.f32.mrf.mxu0  ;;  %v153_v5 = vpop.f32.mrf.mxu1 }
  0x8c   :  { %v144_v8 = vadd.f32 %v143_v4, %v1579_v6  ;;  %v154_v56 = vadd.f32 %v153_v5, %v1579_v6  ;;  %v1626_v4 = vperm.slane %v1576_v3, 3  ;;  %v1379_v5 = vld [vmem:[%s1856_s5 + $0x38] sm:$0xff] }
  0x8d   :  { %974 = vmatpush.bf16.msra.mxu0 %v1379_v5 }
  0x8e   :  { %1162 = vmatmul.msk.bf16.gmra.mxu1 %vm96_vm1, %v1505_v21  ;;  %v330_v15 = vmax.f32 %v144_v8, 0.0  ;;  %v346_v62 = vmax.f32 %v154_v56, 0.0 }
  0x8f   :  { %1170 = vmatmul.msk.bf16.gmra.mxu2 %vm96_vm1, %v1505_v21 }
  0x90   :  { %1178 = vmatmul.msk.bf16.gmra.mxu3 %vm96_vm1, %v1505_v21 }
  0x92   :  { %v163_v9 = vpop.f32.mrf.mxu2 }
  0x93   :  { %v173_v10 = vpop.f32.mrf.mxu3  ;;  %v164_v11 = vadd.f32 %v163_v9, %v1579_v6  ;;  %v145_v13 = vpop.f32.mrf.mxu0 }
  0x94   :  { %v174_v12 = vadd.f32 %v173_v10, %v1579_v6  ;;  %v155_v14 = vpop.f32.mrf.mxu1  ;;  %v146_v16 = vadd.f32 %v145_v13, %v1579_v6 }
  0x95   :  { %v362_v27 = vmax.f32 %v164_v11, 0.0  ;;  %v156_v57 = vadd.f32 %v155_v14, %v1579_v6 }
  0x96   :  { %v334_v18 = vmax.f32 %v146_v16, 0.0  ;;  %v378_v28 = vmax.f32 %v174_v12, 0.0 }
  0x97   :  { %v350_v63 = vmax.f32 %v156_v57, 0.0 }
  0x98   :  { %v394_v20 = vpack.c.bf16 %v334_v18, %v330_v15 }
  0x99   :  { %v402_v9 = vpack.c.bf16 %v350_v63, %v346_v62 }
  0x9a   :  { %v165_v21 = vpop.f32.mrf.mxu2  ;;  %694 = vmatmul.bf16.vlgmr.msrb.gmra.mxu0 %v394_v20 }
  0x9b   :  { %v175_v22 = vpop.f32.mrf.mxu3  ;;  %v166_v23 = vadd.f32 %v165_v21, %v1579_v6  ;;  %v148_v25 = vpop.f32.mrf.mxu0 }
  0x9c   :  { %v176_v24 = vadd.f32 %v175_v22, %v1579_v6  ;;  %v1593_v26 = vpop.f32.mrf.mxu1  ;;  %v149_v33 = vadd.f32 %v148_v25, %v1579_v6 }
  0x9d   :  { %v366_v29 = vmax.f32 %v166_v23, 0.0  ;;  %v159_v22 = vadd.f32 %v1593_v26, %v1579_v6 }
  0x9e   :  { %v382_v30 = vmax.f32 %v176_v24, 0.0  ;;  %1163 = vmatmul.msk.bf16.gmra.mxu1 %vm96_vm1, %v1541_v37  ;;  %v338_v41 = vmax.f32 %v149_v33, 0.0 }
  0x9f   :  { %1171 = vmatmul.msk.bf16.gmra.mxu2 %vm96_vm1, %v1541_v37  ;;  %v1601_v31 = vpack.c.bf16 %v366_v29, %v362_v27  ;;  %v354_v29 = vmax.f32 %v159_v22, 0.0 }
  0xa0   :  { %1179 = vmatmul.msk.bf16.gmra.mxu3 %vm96_vm1, %v1541_v37  ;;  %v1603_v32 = vpack.c.bf16 %v382_v30, %v378_v28 }
  0xa2   :  { %v168_v34 = vpop.f32.mrf.mxu2 }
  0xa3   :  { %v178_v35 = vpop.f32.mrf.mxu3  ;;  %v169_v36 = vadd.f32 %v168_v34, %v1579_v6  ;;  %v150_v39 = vpop.f32.mrf.mxu0 }
  0xa4   :  { %v179_v38 = vadd.f32 %v178_v35, %v1579_v6  ;;  %v160_v40 = vpop.f32.mrf.mxu1  ;;  %v151_v42 = vadd.f32 %v150_v39, %v1579_v6 }
  0xa5   :  { %v370_v50 = vmax.f32 %v169_v36, 0.0  ;;  %v161_v23 = vadd.f32 %v160_v40, %v1579_v6  ;;  %v1378_v36 = vld [vmem:[%s1856_s5 + $0x30] sm:$0xff] }
  0xa6   :  { %v342_v43 = vmax.f32 %v151_v42, 0.0  ;;  %v386_v51 = vmax.f32 %v179_v38, 0.0  ;;  %975 = vmatpush.bf16.msra.mxu0 %v1378_v36 }
  0xa7   :  { %v358_v30 = vmax.f32 %v161_v23, 0.0 }
  0xa8   :  { %v398_v44 = vpack.c.bf16 %v342_v43, %v338_v41 }
  0xa9   :  { %v406_v26 = vpack.c.bf16 %v358_v30, %v354_v29 }
  0xaa   :  { %v170_v37 = vpop.f32.mrf.mxu2  ;;  %699 = vmatmul.bf16.gmra.mxu0 %v398_v44 }
  0xab   :  { %v180_v45 = vpop.f32.mrf.mxu3  ;;  %v171_v46 = vadd.f32 %v170_v37, %v1579_v6 }
  0xac   :  { %v181_v47 = vadd.f32 %v180_v45, %v1579_v6  ;;  %v192_v48 = vpop.f32.mrf.mxu1 }
  0xad   :  { %v374_v52 = vmax.f32 %v171_v46, 0.0  ;;  %v193_v58 = vadd.f32 %v192_v48, %v1612_v49 }
  0xae   :  { %v390_v53 = vmax.f32 %v181_v47, 0.0 }
  0xaf   :  { %v1614_v54 = vpack.c.bf16 %v374_v52, %v370_v50  ;;  %v331_v0 = vmax.f32 %v193_v58, 0.0 }
  0xb0   :  { %v1616_v55 = vpack.c.bf16 %v390_v53, %v386_v51 }
  0xb2   :  { %v241_v59 = vpop.f32.mrf.mxu2 }
  0xb3   :  { %v290_v60 = vpop.f32.mrf.mxu3  ;;  %v242_v10 = vadd.f32 %v241_v59, %v1623_v2 }
  0xb4   :  { %v194_v61 = vpop.f32.mrf.mxu1  ;;  %v291_v11 = vadd.f32 %v290_v60, %v1626_v4 }
  0xb5   :  { %v195_v1 = vadd.f32 %v194_v61, %v1612_v49  ;;  %v332_v16 = vmax.f32 %v242_v10, 0.0  ;;  %v1377_v61 = vld [vmem:[%s1856_s5 + $0x28] sm:$0xff] }
  0xb6   :  { %v333_v17 = vmax.f32 %v291_v11, 0.0  ;;  %976 = vmatpush.bf16.msra.mxu0 %v1377_v61 }
  0xb7   :  { %v335_v7 = vmax.f32 %v195_v1, 0.0 }
  0xb9   :  { %v395_v8 = vpack.c.bf16 %v335_v7, %v331_v0 }
  0xba   :  { %v243_v12 = vpop.f32.mrf.mxu2  ;;  %704 = vmatmul.bf16.gmra.mxu0 %v402_v9 }
  0xbb   :  { %v292_v13 = vpop.f32.mrf.mxu3  ;;  %743 = vmatmul.bf16.vlgmr.msra.gmra.mxu1 %v395_v8  ;;  %v244_v14 = vadd.f32 %v243_v12, %v1623_v2 }
  0xbc   :  { %v293_v3 = vadd.f32 %v292_v13, %v1626_v4  ;;  %v197_v15 = vpop.f32.mrf.mxu1 }
  0xbd   :  { %v336_v18 = vmax.f32 %v244_v14, 0.0  ;;  %v198_v24 = vadd.f32 %v197_v15, %v1612_v49 }
  0xbe   :  { %v337_v19 = vmax.f32 %v293_v3, 0.0 }
  0xbf   :  { %v396_v20 = vpack.c.bf16 %v336_v18, %v332_v16  ;;  %v339_v33 = vmax.f32 %v198_v24, 0.0 }
  0xc0   :  { %v397_v21 = vpack.c.bf16 %v337_v19, %v333_v17 }
  0xc1   :  { %792 = vmatmul.bf16.vlgmr.msra.gmra.mxu2 %v396_v20 }
  0xc2   :  { %841 = vmatmul.bf16.vlgmr.msra.gmra.mxu3 %v397_v21  ;;  %v246_v25 = vpop.f32.mrf.mxu2  ;;  %v1376_v21 = vld [vmem:[%s1856_s5 + $0x20] sm:$0xff] }
  0xc3   :  { %v295_v27 = vpop.f32.mrf.mxu3  ;;  %v247_v6 = vadd.f32 %v246_v25, %v1623_v2  ;;  %977 = vmatpush.bf16.msra.mxu0 %v1376_v21 }
  0xc4   :  { %v199_v28 = vpop.f32.mrf.mxu1  ;;  %v296_v39 = vadd.f32 %v295_v27, %v1626_v4 }
  0xc5   :  { %v200_v34 = vadd.f32 %v199_v28, %v1612_v49  ;;  %v340_v37 = vmax.f32 %v247_v6, 0.0 }
  0xc6   :  { %v341_v45 = vmax.f32 %v296_v39, 0.0 }
  0xc7   :  { %v343_v35 = vmax.f32 %v200_v34, 0.0 }
  0xc9   :  { %v399_v38 = vpack.c.bf16 %v343_v35, %v339_v33 }
  0xca   :  { %v248_v40 = vpop.f32.mrf.mxu2  ;;  %709 = vmatmul.bf16.gmra.mxu0 %v406_v26 }
  0xcb   :  { %v297_v41 = vpop.f32.mrf.mxu3  ;;  %748 = vmatmul.bf16.gmra.mxu1 %v399_v38  ;;  %v249_v42 = vadd.f32 %v248_v40, %v1623_v2 }
  0xcc   :  { %v298_v43 = vadd.f32 %v297_v41, %v1626_v4  ;;  %v202_v44 = vpop.f32.mrf.mxu1 }
  0xcd   :  { %v344_v46 = vmax.f32 %v249_v42, 0.0  ;;  %v203_v51 = vadd.f32 %v202_v44, %v1612_v49  ;;  %v1375_v44 = vld [vmem:[%s1856_s5 + $0x18] sm:$0xff] }
  0xce   :  { %v345_v47 = vmax.f32 %v298_v43, 0.0  ;;  %978 = vmatpush.bf16.msra.mxu0 %v1375_v44 }
  0xcf   :  { %v400_v48 = vpack.c.bf16 %v344_v46, %v340_v37  ;;  %v347_v57 = vmax.f32 %v203_v51, 0.0 }
  0xd0   :  { %v401_v50 = vpack.c.bf16 %v345_v47, %v341_v45 }
  0xd1   :  { %797 = vmatmul.bf16.gmra.mxu2 %v400_v48 }
  0xd2   :  { %846 = vmatmul.bf16.gmra.mxu3 %v401_v50  ;;  %v251_v52 = vpop.f32.mrf.mxu2 }
  0xd3   :  { %v300_v53 = vpop.f32.mrf.mxu3  ;;  %v252_v62 = vadd.f32 %v251_v52, %v1623_v2 }
  0xd4   :  { %v204_v56 = vpop.f32.mrf.mxu1  ;;  %v301_v63 = vadd.f32 %v300_v53, %v1626_v4 }
  0xd5   :  { %v205_v58 = vadd.f32 %v204_v56, %v1612_v49  ;;  %v348_v9 = vmax.f32 %v252_v62, 0.0 }
  0xd6   :  { %v349_v10 = vmax.f32 %v301_v63, 0.0 }
  0xd7   :  { %v351_v59 = vmax.f32 %v205_v58, 0.0 }
  0xd9   :  { %v403_v60 = vpack.c.bf16 %v351_v59, %v347_v57 }
  0xda   :  { %v253_v0 = vpop.f32.mrf.mxu2  ;;  %714 = vmatmul.bf16.gmra.mxu0 %v1601_v31 }
  0xdb   :  { %v302_v1 = vpop.f32.mrf.mxu3  ;;  %753 = vmatmul.bf16.gmra.mxu1 %v403_v60  ;;  %v254_v7 = vadd.f32 %v253_v0, %v1623_v2 }
  0xdc   :  { %v303_v5 = vadd.f32 %v302_v1, %v1626_v4  ;;  %v207_v8 = vpop.f32.mrf.mxu1 }
  0xdd   :  { %v352_v11 = vmax.f32 %v254_v7, 0.0  ;;  %v208_v3 = vadd.f32 %v207_v8, %v1612_v49 }
  0xde   :  { %v353_v12 = vmax.f32 %v303_v5, 0.0  ;;  %v1374_v5 = vld [vmem:[%s1856_s5 + $0x10] sm:$0xff] }
  0xdf   :  { %v404_v13 = vpack.c.bf16 %v352_v11, %v348_v9  ;;  %v355_v17 = vmax.f32 %v208_v3, 0.0  ;;  %979 = vmatpush.bf16.msra.mxu0 %v1374_v5  ;;  %v1708_v5 = vld [vmem:[%s1855_s4] ss:$0 sm:$0xff] }
  0xe0   :  { %v405_v14 = vpack.c.bf16 %v353_v12, %v349_v10 }
  0xe1   :  { %802 = vmatmul.bf16.gmra.mxu2 %v404_v13 }
  0xe2   :  { %851 = vmatmul.bf16.gmra.mxu3 %v405_v14  ;;  %v256_v15 = vpop.f32.mrf.mxu2 }
  0xe3   :  { %v305_v16 = vpop.f32.mrf.mxu3  ;;  %v257_v22 = vadd.f32 %v256_v15, %v1623_v2 }
  0xe4   :  { %v209_v31 = vpop.f32.mrf.mxu1  ;;  %v306_v23 = vadd.f32 %v305_v16, %v1626_v4 }
  0xe5   :  { %v210_v18 = vadd.f32 %v209_v31, %v1612_v49  ;;  %v356_v30 = vmax.f32 %v257_v22, 0.0 }
  0xe6   :  { %v357_v33 = vmax.f32 %v306_v23, 0.0 }
  0xe7   :  { %v359_v19 = vmax.f32 %v210_v18, 0.0 }
  0xe9   :  { %v407_v20 = vpack.c.bf16 %v359_v19, %v355_v17 }
  0xea   :  { %v258_v24 = vpop.f32.mrf.mxu2  ;;  %719 = vmatmul.bf16.gmra.mxu0 %v1614_v54 }
  0xeb   :  { %v307_v25 = vpop.f32.mrf.mxu3  ;;  %758 = vmatmul.bf16.gmra.mxu1 %v407_v20  ;;  %v259_v27 = vadd.f32 %v258_v24, %v1623_v2 }
  0xec   :  { %v308_v28 = vadd.f32 %v307_v25, %v1626_v4  ;;  %v212_v29 = vpop.f32.mrf.mxu1 }
  0xed   :  { %v360_v34 = vmax.f32 %v259_v27, 0.0  ;;  %v213_v38 = vadd.f32 %v212_v29, %v1612_v49 }
  0xee   :  { %v361_v35 = vmax.f32 %v308_v28, 0.0 }
  0xef   :  { %v408_v36 = vpack.c.bf16 %v360_v34, %v356_v30  ;;  %v363_v40 = vmax.f32 %v213_v38, 0.0 }
  0xf0   :  { %v409_v26 = vpack.c.bf16 %v361_v35, %v357_v33 }
  0xf1   :  { %807 = vmatmul.bf16.gmra.mxu2 %v408_v36 }
  0xf2   :  { %856 = vmatmul.bf16.gmra.mxu3 %v409_v26  ;;  %v261_v6 = vpop.f32.mrf.mxu2 }
  0xf3   :  { %v310_v39 = vpop.f32.mrf.mxu3  ;;  %v262_v37 = vadd.f32 %v261_v6, %v1623_v2 }
  0xf4   :  { %v214_v54 = vpop.f32.mrf.mxu1  ;;  %v311_v45 = vadd.f32 %v310_v39, %v1626_v4 }
  0xf5   :  { %v215_v41 = vadd.f32 %v214_v54, %v1612_v49  ;;  %v364_v52 = vmax.f32 %v262_v37, 0.0 }
  0xf6   :  { %v365_v53 = vmax.f32 %v311_v45, 0.0 }
  0xf7   :  { %v367_v42 = vmax.f32 %v215_v41, 0.0 }
  0xf9   :  { %v411_v43 = vpack.c.bf16 %v367_v42, %v363_v40 }
  0xfa   :  { %v263_v46 = vpop.f32.mrf.mxu2  ;;  %724 = vmatmul.bf16.gmra.mxu0 %v1603_v32 }
  0xfb   :  { %v312_v47 = vpop.f32.mrf.mxu3  ;;  %763 = vmatmul.bf16.gmra.mxu1 %v411_v43  ;;  %v264_v48 = vadd.f32 %v263_v46, %v1623_v2 }
  0xfc   :  { %v313_v50 = vadd.f32 %v312_v47, %v1626_v4  ;;  %v217_v51 = vpop.f32.mrf.mxu1 }
  0xfd   :  { %v368_v56 = vmax.f32 %v264_v48, 0.0  ;;  %v218_v60 = vadd.f32 %v217_v51, %v1612_v49 }
  0xfe   :  { %v369_v57 = vmax.f32 %v313_v50, 0.0 }
  0xff   :  { %v412_v58 = vpack.c.bf16 %v368_v56, %v364_v52  ;;  %v371_v63 = vmax.f32 %v218_v60, 0.0 }
 0x100   :  { %v413_v59 = vpack.c.bf16 %v369_v57, %v365_v53  ;;  %v1372_v53 = vld [vmem:[%s1856_s5] sm:$0xff] }
 0x101   :  { %812 = vmatmul.bf16.gmra.mxu2 %v412_v58 }
 0x102   :  { %861 = vmatmul.bf16.gmra.mxu3 %v413_v59  ;;  %v266_v61 = vpop.f32.mrf.mxu2 }
 0x103   :  { %v315_v62 = vpop.f32.mrf.mxu3  ;;  %v267_v8 = vadd.f32 %v266_v61, %v1623_v2 }
 0x104   :  { %v219_v32 = vpop.f32.mrf.mxu1  ;;  %v316_v9 = vadd.f32 %v315_v62, %v1626_v4 }
 0x105   :  { %v220_v0 = vadd.f32 %v219_v32, %v1612_v49  ;;  %v372_v3 = vmax.f32 %v267_v8, 0.0 }
 0x106   :  { %v373_v15 = vmax.f32 %v316_v9, 0.0 }
 0x107   :  { %v375_v1 = vmax.f32 %v220_v0, 0.0 }
 0x109   :  { %v415_v7 = vpack.c.bf16 %v375_v1, %v371_v63 }
 0x10a   :  { %v268_v10 = vpop.f32.mrf.mxu2  ;;  %729 = vmatmul.bf16.gmra.mxu0 %v1616_v55  ;;  %v1373_v55 = vld [vmem:[%s1856_s5 + $0x8] sm:$0xff] }
 0x10b   :  { %v317_v11 = vpop.f32.mrf.mxu3  ;;  %768 = vmatmul.bf16.gmra.mxu1 %v415_v7  ;;  %v269_v12 = vadd.f32 %v268_v10, %v1623_v2  ;;  %980 = vmatpush.bf16.msra.mxu0 %v1373_v55 }
 0x10c   :  { %v318_v13 = vadd.f32 %v317_v11, %v1626_v4  ;;  %v222_v14 = vpop.f32.mrf.mxu1 }
 0x10d   :  { %v376_v16 = vmax.f32 %v269_v12, 0.0  ;;  %v223_v19 = vadd.f32 %v222_v14, %v1612_v49 }
 0x10e   :  { %v377_v31 = vmax.f32 %v318_v13, 0.0 }
 0x10f   :  { %v416_v17 = vpack.c.bf16 %v376_v16, %v372_v3  ;;  %v379_v23 = vmax.f32 %v223_v19, 0.0  ;;  %981 = vmatpush.bf16.msra.mxu0 %v1372_v53 }
 0x110   :  { %v417_v18 = vpack.c.bf16 %v377_v31, %v373_v15 }
 0x111   :  { %817 = vmatmul.bf16.gmra.mxu2 %v416_v17 }
 0x112   :  { %866 = vmatmul.bf16.gmra.mxu3 %v417_v18  ;;  %v271_v20 = vpop.f32.mrf.mxu2 }
 0x113   :  { %v320_v21 = vpop.f32.mrf.mxu3  ;;  %v272_v28 = vadd.f32 %v271_v20, %v1623_v2 }
 0x114   :  { %v224_v22 = vpop.f32.mrf.mxu1  ;;  %v321_v29 = vadd.f32 %v320_v21, %v1626_v4 }
 0x115   :  { %v225_v24 = vadd.f32 %v224_v22, %v1612_v49  ;;  %v380_v26 = vmax.f32 %v272_v28, 0.0 }
 0x116   :  { %v381_v38 = vmax.f32 %v321_v29, 0.0 }
 0x117   :  { %v383_v25 = vmax.f32 %v225_v24, 0.0  ;;  %v695_v54 = vpop.f32.mrf.mxu0 }
 0x119   :  { %v419_v27 = vpack.c.bf16 %v383_v25, %v379_v23 }
 0x11a   :  { %v273_v30 = vpop.f32.mrf.mxu2 }
 0x11b   :  { %v322_v33 = vpop.f32.mrf.mxu3  ;;  %773 = vmatmul.bf16.gmra.mxu1 %v419_v27  ;;  %v274_v34 = vadd.f32 %v273_v30, %v1623_v2 }
 0x11c   :  { %v323_v35 = vadd.f32 %v322_v33, %v1626_v4  ;;  %v227_v36 = vpop.f32.mrf.mxu1 }
 0x11d   :  { %v384_v6 = vmax.f32 %v274_v34, 0.0  ;;  %v228_v42 = vadd.f32 %v227_v36, %v1612_v49 }
 0x11e   :  { %v385_v39 = vmax.f32 %v323_v35, 0.0 }
 0x11f   :  { %v420_v40 = vpack.c.bf16 %v384_v6, %v380_v26  ;;  %v387_v45 = vmax.f32 %v228_v42, 0.0  ;;  %v697_v50 = vpop.f32.mrf.mxu0 }
 0x120   :  { %v421_v41 = vpack.c.bf16 %v385_v39, %v381_v38  ;;  %v698_v13 = vadd.f32 %v1708_v5, %v697_v50 }
 0x121   :  { %822 = vmatmul.bf16.gmra.mxu2 %v420_v40 }
 0x122   :  { %871 = vmatmul.bf16.gmra.mxu3 %v421_v41  ;;  %v276_v43 = vpop.f32.mrf.mxu2 }
 0x123   :  { %v325_v44 = vpop.f32.mrf.mxu3  ;;  %v277_v51 = vadd.f32 %v276_v43, %v1623_v2 }
 0x124   :  { %v229_v37 = vpop.f32.mrf.mxu1  ;;  %v326_v52 = vadd.f32 %v325_v44, %v1626_v4 }
 0x125   :  { %v230_v46 = vadd.f32 %v229_v37, %v1612_v49  ;;  %v388_v49 = vmax.f32 %v277_v51, 0.0 }
 0x126   :  { %v389_v60 = vmax.f32 %v326_v52, 0.0 }
 0x127   :  { %v391_v47 = vmax.f32 %v230_v46, 0.0  ;;  %v700_v0 = vpop.f32.mrf.mxu0 }
 0x128   :  { %v701_v22 = vadd.f32 %v1708_v5, %v700_v0 }
 0x129   :  { %v423_v48 = vpack.c.bf16 %v391_v47, %v387_v45 }
 0x12a   :  { %v278_v56 = vpop.f32.mrf.mxu2 }
 0x12b   :  { %v327_v57 = vpop.f32.mrf.mxu3  ;;  %778 = vmatmul.bf16.gmra.mxu1 %v423_v48  ;;  %v279_v58 = vadd.f32 %v278_v56, %v1623_v2 }
 0x12c   :  { %v328_v59 = vadd.f32 %v327_v57, %v1626_v4  ;;  %v696_v4 = vadd.f32 %v1708_v5, %v695_v54 }
 0x12d   :  { %v392_v61 = vmax.f32 %v279_v58, 0.0 }
 0x12e   :  { %v393_v62 = vmax.f32 %v328_v59, 0.0 }
 0x12f   :  { %v424_v32 = vpack.c.bf16 %v392_v61, %v388_v49  ;;  %v702_v7 = vpop.f32.mrf.mxu0 }
 0x130   :  { %v425_v63 = vpack.c.bf16 %v393_v62, %v389_v60  ;;  %v703_v29 = vadd.f32 %v1708_v5, %v702_v7 }
 0x131   :  { %827 = vmatmul.bf16.gmra.mxu2 %v424_v32 }
 0x132   :  { %876 = vmatmul.bf16.gmra.mxu3 %v425_v63 }
 0x137   :  { %v705_v10 = vpop.f32.mrf.mxu0 }
 0x138   :  { %v744_v1 = vpop.f32.mrf.mxu1  ;;  %v706_v44 = vadd.f32 %v1708_v5, %v705_v10 }
 0x139   :  { %v745_v11 = vadd.f32 %v744_v1, %v696_v4 }
 0x13f   :  { %v707_v55 = vpop.f32.mrf.mxu0 }
 0x140   :  { %v746_v2 = vpop.f32.mrf.mxu1  ;;  %v708_v47 = vadd.f32 %v1708_v5, %v707_v55 }
 0x141   :  { %v747_v3 = vadd.f32 %v746_v2, %v698_v13 }
 0x144   :  { %v793_v8 = vpop.f32.mrf.mxu2 }
 0x145   :  { %v842_v9 = vpop.f32.mrf.mxu3  ;;  %v794_v14 = vadd.f32 %v793_v8, %v745_v11 }
 0x147   :  { %v843_v31 = vadd.f32 %v842_v9, %v794_v14  ;;  %v710_v33 = vpop.f32.mrf.mxu0 }
 0x148   :  { %v749_v12 = vpop.f32.mrf.mxu1  ;;  %v711_v63 = vadd.f32 %v1708_v5, %v710_v33 }
 0x149   :  { %v882_v20 = vmax.f32 %v843_v31, 0.0  ;;  %v750_v27 = vadd.f32 %v749_v12, %v701_v22 }
 0x14c   :  { %v795_v15 = vpop.f32.mrf.mxu2 }
 0x14d   :  { %v844_v16 = vpop.f32.mrf.mxu3  ;;  %v796_v17 = vadd.f32 %v795_v15, %v747_v3 }
 0x14f   :  { %v845_v18 = vadd.f32 %v844_v16, %v796_v17  ;;  %v712_v37 = vpop.f32.mrf.mxu0 }
 0x150   :  { %v751_v19 = vpop.f32.mrf.mxu1  ;;  %v713_v7 = vadd.f32 %v1708_v5, %v712_v37 }
 0x151   :  { %v883_v21 = vmax.f32 %v845_v18, 0.0  ;;  %v752_v34 = vadd.f32 %v751_v19, %v703_v29 }
 0x153   :  { %v898_v23 = vpack.c.bf16 %v883_v21, %v882_v20 }
 0x154   :  { %v798_v24 = vpop.f32.mrf.mxu2 }
 0x155   :  { %v847_v25 = vpop.f32.mrf.mxu3  ;;  %982 = vmatmul.bf16.vlgmr.msra.gmra.mxu0 %v898_v23  ;;  %v799_v30 = vadd.f32 %v798_v24, %v750_v27 }
 0x157   :  { %v848_v26 = vadd.f32 %v847_v25, %v799_v30  ;;  %v715_v57 = vpop.f32.mrf.mxu0 }
 0x158   :  { %v754_v28 = vpop.f32.mrf.mxu1  ;;  %v716_v19 = vadd.f32 %v1708_v5, %v715_v57 }
 0x159   :  { %v884_v54 = vmax.f32 %v848_v26, 0.0  ;;  %v755_v45 = vadd.f32 %v754_v28, %v706_v44 }
 0x15c   :  { %v800_v35 = vpop.f32.mrf.mxu2 }
 0x15d   :  { %v849_v36 = vpop.f32.mrf.mxu3  ;;  %v801_v38 = vadd.f32 %v800_v35, %v752_v34 }
 0x15f   :  { %v850_v6 = vadd.f32 %v849_v36, %v801_v38  ;;  %v717_v2 = vpop.f32.mrf.mxu0 }
 0x160   :  { %v756_v39 = vpop.f32.mrf.mxu1  ;;  %v718_v21 = vadd.f32 %v1708_v5, %v717_v2 }
 0x161   :  { %v885_v40 = vmax.f32 %v850_v6, 0.0  ;;  %v757_v50 = vadd.f32 %v756_v39, %v708_v47 }
 0x163   :  { %v899_v41 = vpack.c.bf16 %v885_v40, %v884_v54 }
 0x164   :  { %v803_v42 = vpop.f32.mrf.mxu2 }
 0x165   :  { %v852_v43 = vpop.f32.mrf.mxu3  ;;  %987 = vmatmul.bf16.gmra.mxu0 %v899_v41  ;;  %v804_v48 = vadd.f32 %v803_v42, %v755_v45 }
 0x167   :  { %v853_v53 = vadd.f32 %v852_v43, %v804_v48  ;;  %v720_v16 = vpop.f32.mrf.mxu0 }
 0x168   :  { %v759_v46 = vpop.f32.mrf.mxu1  ;;  %v721_v6 = vadd.f32 %v1708_v5, %v720_v16 }
 0x169   :  { %v886_v49 = vmax.f32 %v853_v53, 0.0  ;;  %v760_v0 = vadd.f32 %v759_v46, %v711_v63 }
 0x16c   :  { %v805_v51 = vpop.f32.mrf.mxu2 }
 0x16d   :  { %v854_v52 = vpop.f32.mrf.mxu3  ;;  %v806_v56 = vadd.f32 %v805_v51, %v757_v50 }
 0x16f   :  { %v855_v58 = vadd.f32 %v854_v52, %v806_v56  ;;  %v722_v27 = vpop.f32.mrf.mxu0 }
 0x170   :  { %v761_v59 = vpop.f32.mrf.mxu1  ;;  %v723_v40 = vadd.f32 %v1708_v5, %v722_v27 }
 0x171   :  { %v887_v60 = vmax.f32 %v855_v58, 0.0  ;;  %v762_v8 = vadd.f32 %v761_v59, %v713_v7 }
 0x173   :  { %v900_v61 = vpack.c.bf16 %v887_v60, %v886_v49 }
 0x174   :  { %v808_v62 = vpop.f32.mrf.mxu2 }
 0x175   :  { %v857_v32 = vpop.f32.mrf.mxu3  ;;  %992 = vmatmul.bf16.gmra.mxu0 %v900_v61  ;;  %v809_v4 = vadd.f32 %v808_v62, %v760_v0 }
 0x177   :  { %v858_v11 = vadd.f32 %v857_v32, %v809_v4  ;;  %v725_v39 = vpop.f32.mrf.mxu0 }
 0x178   :  { %v764_v1 = vpop.f32.mrf.mxu1  ;;  %v726_v58 = vadd.f32 %v1708_v5, %v725_v39 }
 0x179   :  { %v888_v3 = vmax.f32 %v858_v11, 0.0  ;;  %v765_v55 = vadd.f32 %v764_v1, %v716_v19 }
 0x17c   :  { %v810_v9 = vpop.f32.mrf.mxu2 }
 0x17d   :  { %v859_v10 = vpop.f32.mrf.mxu3  ;;  %v811_v12 = vadd.f32 %v810_v9, %v762_v8 }
 0x17f   :  { %v860_v13 = vadd.f32 %v859_v10, %v811_v12  ;;  %v727_v48 = vpop.f32.mrf.mxu0 }
 0x180   :  { %v766_v14 = vpop.f32.mrf.mxu1  ;;  %v728_v49 = vadd.f32 %v1708_v5, %v727_v48 }
 0x181   :  { %v889_v15 = vmax.f32 %v860_v13, 0.0  ;;  %v767_v23 = vadd.f32 %v766_v14, %v718_v21 }
 0x183   :  { %v901_v31 = vpack.c.bf16 %v889_v15, %v888_v3 }
 0x184   :  { %v813_v17 = vpop.f32.mrf.mxu2 }
 0x185   :  { %v862_v18 = vpop.f32.mrf.mxu3  ;;  %997 = vmatmul.bf16.gmra.mxu0 %v901_v31  ;;  %v814_v22 = vadd.f32 %v813_v17, %v765_v55 }
 0x187   :  { %v863_v28 = vadd.f32 %v862_v18, %v814_v22  ;;  %v730_v61 = vpop.f32.mrf.mxu0 }
 0x188   :  { %v769_v20 = vpop.f32.mrf.mxu1  ;;  %v731_v12 = vadd.f32 %v1708_v5, %v730_v61 }
 0x189   :  { %v890_v34 = vmax.f32 %v863_v28, 0.0  ;;  %v770_v54 = vadd.f32 %v769_v20, %v721_v6 }
 0x18c   :  { %v815_v24 = vpop.f32.mrf.mxu2 }
 0x18d   :  { %v864_v25 = vpop.f32.mrf.mxu3  ;;  %v816_v29 = vadd.f32 %v815_v24, %v767_v23  ;;  %v1729_v24 = vld [vmem:[%s1857_s6] ss:$0 sm:$0xff] }
 0x18f   :  { %v865_v30 = vadd.f32 %v864_v25, %v816_v29  ;;  %v732_v13 = vpop.f32.mrf.mxu0 }
 0x190   :  { %v771_v33 = vpop.f32.mrf.mxu1  ;;  %v733_v15 = vadd.f32 %v1708_v5, %v732_v13  ;;  %v1735_v5 = vld [vmem:[%s1858_s7] ss:$0 sm:$0xff] }
 0x191   :  { %v891_v35 = vmax.f32 %v865_v30, 0.0  ;;  %v772_v43 = vadd.f32 %v771_v33, %v723_v40 }
 0x193   :  { %v902_v36 = vpack.c.bf16 %v891_v35, %v890_v34 }
 0x194   :  { %v818_v26 = vpop.f32.mrf.mxu2 }
 0x195   :  { %v867_v38 = vpop.f32.mrf.mxu3  ;;  %1002 = vmatmul.bf16.gmra.mxu0 %v902_v36  ;;  %v819_v41 = vadd.f32 %v818_v26, %v770_v54 }
 0x197   :  { %v868_v45 = vadd.f32 %v867_v38, %v819_v41 }
 0x198   :  { %v774_v42 = vpop.f32.mrf.mxu1 }
 0x199   :  { %v892_v50 = vmax.f32 %v868_v45, 0.0  ;;  %v775_v59 = vadd.f32 %v774_v42, %v726_v58 }
 0x19c   :  { %v820_v44 = vpop.f32.mrf.mxu2 }
 0x19d   :  { %v869_v37 = vpop.f32.mrf.mxu3  ;;  %v821_v46 = vadd.f32 %v820_v44, %v772_v43 }
 0x19f   :  { %v870_v47 = vadd.f32 %v869_v37, %v821_v46 }
 0x1a0   :  { %v776_v53 = vpop.f32.mrf.mxu1 }
 0x1a1   :  { %v893_v51 = vmax.f32 %v870_v47, 0.0  ;;  %v777_v62 = vadd.f32 %v776_v53, %v728_v49 }
 0x1a3   :  { %v903_v52 = vpack.c.bf16 %v893_v51, %v892_v50 }
 0x1a4   :  { %v823_v56 = vpop.f32.mrf.mxu2 }
 0x1a5   :  { %v872_v57 = vpop.f32.mrf.mxu3  ;;  %1007 = vmatmul.bf16.gmra.mxu0 %v903_v52  ;;  %v824_v60 = vadd.f32 %v823_v56, %v775_v59 }
 0x1a7   :  { %v873_v0 = vadd.f32 %v872_v57, %v824_v60 }
 0x1a8   :  { %v779_v7 = vpop.f32.mrf.mxu1 }
 0x1a9   :  { %v894_v4 = vmax.f32 %v873_v0, 0.0  ;;  %v780_v14 = vadd.f32 %v779_v7, %v731_v12 }
 0x1ac   :  { %v825_v32 = vpop.f32.mrf.mxu2 }
 0x1ad   :  { %v874_v63 = vpop.f32.mrf.mxu3  ;;  %v826_v1 = vadd.f32 %v825_v32, %v777_v62 }
 0x1af   :  { %v875_v2 = vadd.f32 %v874_v63, %v826_v1 }
 0x1b0   :  { %v781_v3 = vpop.f32.mrf.mxu1 }
 0x1b1   :  { %v895_v8 = vmax.f32 %v875_v2, 0.0  ;;  %v782_v31 = vadd.f32 %v781_v3, %v733_v15 }
 0x1b3   :  { %v904_v9 = vpack.c.bf16 %v895_v8, %v894_v4 }
 0x1b4   :  { %v828_v10 = vpop.f32.mrf.mxu2 }
 0x1b5   :  { %v877_v11 = vpop.f32.mrf.mxu3  ;;  %1012 = vmatmul.bf16.gmra.mxu0 %v904_v9  ;;  %v829_v16 = vadd.f32 %v828_v10, %v780_v14 }
 0x1b7   :  { %v878_v18 = vadd.f32 %v877_v11, %v829_v16 }
 0x1b9   :  { %v896_v21 = vmax.f32 %v878_v18, 0.0 }
 0x1bc   :  { %v830_v17 = vpop.f32.mrf.mxu2 }
 0x1bd   :  { %v831_v19 = vadd.f32 %v830_v17, %v782_v31  ;;  %v879_v55 = vpop.f32.mrf.mxu3 }
 0x1bf   :  { %v880_v20 = vadd.f32 %v879_v55, %v831_v19 }
 0x1c1   :  { %v897_v22 = vmax.f32 %v880_v20, 0.0 }
 0x1c3   :  { %v905_v23 = vpack.c.bf16 %v897_v22, %v896_v21 }
 0x1c5   :  { %1017 = vmatmul.bf16.gmra.mxu0 %v905_v23 }
 0x1d2   :  { %v983_v25 = vpop.f32.mrf.mxu0 }
 0x1d3   :  { %v984_v27 = vadd.f32 %v1729_v24, %v983_v25 }
 0x1d5   :  { %v1023_v28 = vmax.f32 %v984_v27, 0.0 }
 0x1d7   :  { %v1043_v29 = vmul.f32 %v1735_v5, %v1023_v28 }
 0x1d9   :  { %v1060_v30 = vsel %vm1059_vm2, %v1043_v29, 0.0 }
 0x1da   :  { %v985_v33 = vpop.f32.mrf.mxu0  ;;  %1061 = vadd.xlane.f32.xlu0 %v1060_v30 }
 0x1db   :  { %v986_v34 = vadd.f32 %v1729_v24, %v985_v33 }
 0x1dd   :  { %v1024_v35 = vmax.f32 %v986_v34, 0.0 }
 0x1df   :  { %v1044_v36 = vmul.f32 %v1735_v5, %v1024_v35 }
 0x1e1   :  { %v1063_v26 = vsel %vm1059_vm2, %v1044_v36, 0.0 }
 0x1e2   :  { %v988_v38 = vpop.f32.mrf.mxu0  ;;  %1064 = vadd.xlane.f32.xlu0 %v1063_v26 }
 0x1e3   :  { %v989_v6 = vadd.f32 %v1729_v24, %v988_v38 }
 0x1e5   :  { %v1025_v39 = vmax.f32 %v989_v6, 0.0 }
 0x1e7   :  { %v1045_v54 = vmul.f32 %v1735_v5, %v1025_v39 }
 0x1e9   :  { %v1066_v40 = vsel %vm1059_vm2, %v1045_v54, 0.0 }
 0x1ea   :  { %v990_v41 = vpop.f32.mrf.mxu0  ;;  %1067 = vadd.xlane.f32.xlu1 %v1066_v40 }
 0x1eb   :  { %v991_v42 = vadd.f32 %v1729_v24, %v990_v41  ;;  %v1109_v41 = vstv %s1859_s8 }
 0x1ed   :  { %v1026_v43 = vmax.f32 %v991_v42, 0.0 }
 0x1ef   :  { %v1046_v44 = vmul.f32 %v1735_v5, %v1026_v43 }
 0x1f1   :  { %v1069_v37 = vsel %vm1059_vm2, %v1046_v44, 0.0 }
 0x1f2   :  { %v993_v45 = vpop.f32.mrf.mxu0  ;;  %1070 = vadd.xlane.f32.xlu1 %v1069_v37 }
 0x1f3   :  { %v994_v46 = vadd.f32 %v1729_v24, %v993_v45 }
 0x1f5   :  { %v1027_v47 = vmax.f32 %v994_v46, 0.0 }
 0x1f7   :  { %v1047_v48 = vmul.f32 %v1735_v5, %v1027_v47 }
 0x1f9   :  { %v1072_v50 = vsel %vm1059_vm2, %v1047_v48, 0.0 }
 0x1fa   :  { %v995_v51 = vpop.f32.mrf.mxu0  ;;  %1073 = vadd.xlane.f32.xlu2 %v1072_v50 }
 0x1fb   :  { %v996_v52 = vadd.f32 %v1729_v24, %v995_v51 }
 0x1fd   :  { %v1028_v53 = vmax.f32 %v996_v52, 0.0 }
 0x1ff   :  { %v1048_v56 = vmul.f32 %v1735_v5, %v1028_v53 }
 0x201   :  { %v1075_v57 = vsel %vm1059_vm2, %v1048_v56, 0.0 }
 0x202   :  { %v998_v58 = vpop.f32.mrf.mxu0  ;;  %1076 = vadd.xlane.f32.xlu2 %v1075_v57 }
 0x203   :  { %v999_v59 = vadd.f32 %v1729_v24, %v998_v58 }
 0x205   :  { %v1029_v49 = vmax.f32 %v999_v59, 0.0 }
 0x207   :  { %v1049_v60 = vmul.f32 %v1735_v5, %v1029_v49 }
 0x209   :  { %v1078_v61 = vsel %vm1059_vm2, %v1049_v60, 0.0 }
 0x20a   :  { %v1000_v62 = vpop.f32.mrf.mxu0  ;;  %1079 = vadd.xlane.f32.xlu0 %v1078_v61 }
 0x20b   :  { %v1001_v32 = vadd.f32 %v1729_v24, %v1000_v62 }
 0x20d   :  { %v1030_v63 = vmax.f32 %v1001_v32, 0.0 }
 0x20f   :  { %v1050_v0 = vmul.f32 %v1735_v5, %v1030_v63 }
 0x211   :  { %v1081_v1 = vsel %vm1059_vm2, %v1050_v0, 0.0 }
 0x212   :  { %v1003_v7 = vpop.f32.mrf.mxu0  ;;  %1082 = vadd.xlane.f32.xlu1 %v1081_v1 }
 0x213   :  { %v1004_v2 = vadd.f32 %v1729_v24, %v1003_v7 }
 0x215   :  { %v1031_v4 = vmax.f32 %v1004_v2, 0.0 }
 0x217   :  { %v1051_v8 = vmul.f32 %v1735_v5, %v1031_v4 }
 0x219   :  { %v1084_v9 = vsel %vm1059_vm2, %v1051_v8, 0.0 }
 0x21a   :  { %v1005_v10 = vpop.f32.mrf.mxu0  ;;  %1085 = vadd.xlane.f32.xlu2 %v1084_v9 }
 0x21b   :  { %v1006_v11 = vadd.f32 %v1729_v24, %v1005_v10 }
 0x21d   :  { %v1032_v12 = vmax.f32 %v1006_v11, 0.0 }
 0x21f   :  { %v1052_v13 = vmul.f32 %v1735_v5, %v1032_v12 }
 0x221   :  { %v1087_v14 = vsel %vm1059_vm2, %v1052_v13, 0.0 }
 0x222   :  { %v1008_v3 = vpop.f32.mrf.mxu0  ;;  %1088 = vadd.xlane.f32.xlu0 %v1087_v14 }
 0x223   :  { %v1009_v15 = vadd.f32 %v1729_v24, %v1008_v3 }
 0x225   :  { %v1033_v16 = vmax.f32 %v1009_v15, 0.0 }
 0x227   :  { %v1053_v31 = vmul.f32 %v1735_v5, %v1033_v16 }
 0x229   :  { %v1090_v17 = vsel %vm1059_vm2, %v1053_v31, 0.0 }
 0x22a   :  { %v1010_v18 = vpop.f32.mrf.mxu0  ;;  %1091 = vadd.xlane.f32.xlu1 %v1090_v17 }
 0x22b   :  { %v1011_v19 = vadd.f32 %v1729_v24, %v1010_v18 }
 0x22d   :  { %v1034_v55 = vmax.f32 %v1011_v19, 0.0 }
 0x22f   :  { %v1054_v20 = vmul.f32 %v1735_v5, %v1034_v55 }
 0x231   :  { %v1093_v21 = vsel %vm1059_vm2, %v1054_v20, 0.0 }
 0x232   :  { %v1013_v22 = vpop.f32.mrf.mxu0  ;;  %1094 = vadd.xlane.f32.xlu2 %v1093_v21 }
 0x233   :  { %v1014_v23 = vadd.f32 %v1729_v24, %v1013_v22 }
 0x235   :  { %v1035_v25 = vmax.f32 %v1014_v23, 0.0 }
 0x237   :  { %v1055_v27 = vmul.f32 %v1735_v5, %v1035_v25 }
 0x239   :  { %v1096_v28 = vsel %vm1059_vm2, %v1055_v27, 0.0 }
 0x23a   :  { %v1015_v29 = vpop.f32.mrf.mxu0  ;;  %1097 = vadd.xlane.f32.xlu0 %v1096_v28 }
 0x23b   :  { %v1016_v30 = vadd.f32 %v1729_v24, %v1015_v29 }
 0x23d   :  { %v1036_v33 = vmax.f32 %v1016_v30, 0.0 }
 0x23f   :  { %v1056_v34 = vmul.f32 %v1735_v5, %v1036_v33 }
 0x241   :  { %v1099_v35 = vsel %vm1059_vm2, %v1056_v34, 0.0 }
 0x242   :  { %v1018_v36 = vpop.f32.mrf.mxu0  ;;  %1100 = vadd.xlane.f32.xlu1 %v1099_v35 }
 0x243   :  { %v1019_v26 = vadd.f32 %v1729_v24, %v1018_v36 }
 0x245   :  { %v1037_v38 = vmax.f32 %v1019_v26, 0.0 }
 0x247   :  { %v1057_v6 = vmul.f32 %v1735_v5, %v1037_v38 }
 0x249   :  { %v1102_v39 = vsel %vm1059_vm2, %v1057_v6, 0.0 }
 0x24a   :  { %v1020_v54 = vpop.f32.mrf.mxu0  ;;  %1103 = vadd.xlane.f32.xlu2 %v1102_v39 }
 0x24b   :  { %v1021_v40 = vadd.f32 %v1729_v24, %v1020_v54 }
 0x24d   :  { %v1038_v42 = vmax.f32 %v1021_v40, 0.0  ;;  %v1062_v43 = vpop.xlane.xlu0 %1061 }
 0x24e   :  { %v1110_v44 = vadd.f32 %v1109_v41, %v1062_v43 }
 0x24f   :  { %v1058_v37 = vmul.f32 %v1735_v5, %v1038_v42 }
 0x250   :  { %1127 = vst.msk [vmem:[%s1860_s9] sm:$0xff] %vm1126_vm3, %v1110_v44 }
 0x251   :  { %v1105_v45 = vsel %vm1059_vm2, %v1058_v37, 0.0 }
 0x252   :  { %1106 = vadd.xlane.f32.xlu0 %v1105_v45 }
 0x255   :  { %v1065_v46 = vpop.xlane.xlu0 %1064 }
 0x256   :  { %v1111_v24 = vadd.f32 %v1109_v41, %v1065_v46 }
 0x258   :  { %1128 = vst.msk [vmem:[%s1860_s9 + $0x8] sm:$0xff] %vm1126_vm3, %v1111_v24 }
 0x25d   :  { %v1068_v47 = vpop.xlane.xlu1 %1067 }
 0x25e   :  { %v1112_v48 = vadd.f32 %v1109_v41, %v1068_v47 }
 0x260   :  { %1129 = vst.msk [vmem:[%s1860_s9 + $0x10] sm:$0xff] %vm1126_vm3, %v1112_v48 }
 0x265   :  { %v1071_v5 = vpop.xlane.xlu1 %1070 }
 0x266   :  { %v1113_v50 = vadd.f32 %v1109_v41, %v1071_v5 }
 0x268   :  { %1130 = vst.msk [vmem:[%s1860_s9 + $0x18] sm:$0xff] %vm1126_vm3, %v1113_v50 }
 0x26d   :  { %v1074_v51 = vpop.xlane.xlu2 %1073 }
 0x26e   :  { %v1114_v52 = vadd.f32 %v1109_v41, %v1074_v51 }
 0x270   :  { %1131 = vst.msk [vmem:[%s1860_s9 + $0x20] sm:$0xff] %vm1126_vm3, %v1114_v52 }
 0x275   :  { %v1077_v53 = vpop.xlane.xlu2 %1076 }
 0x276   :  { %v1115_v56 = vadd.f32 %v1109_v41, %v1077_v53 }
 0x278   :  { %1132 = vst.msk [vmem:[%s1860_s9 + $0x28] sm:$0xff] %vm1126_vm3, %v1115_v56 }
 0x27d   :  { %v1080_v57 = vpop.xlane.xlu0 %1079 }
 0x27e   :  { %v1116_v58 = vadd.f32 %v1109_v41, %v1080_v57 }
 0x280   :  { %1133 = vst.msk [vmem:[%s1860_s9 + $0x30] sm:$0xff] %vm1126_vm3, %v1116_v58 }
 0x285   :  { %v1083_v59 = vpop.xlane.xlu1 %1082 }
 0x286   :  { %v1117_v49 = vadd.f32 %v1109_v41, %v1083_v59 }
 0x288   :  { %1134 = vst.msk [vmem:[%s1860_s9 + $0x38] sm:$0xff] %vm1126_vm3, %v1117_v49 }
 0x28d   :  { %v1086_v60 = vpop.xlane.xlu2 %1085 }
 0x28e   :  { %v1118_v61 = vadd.f32 %v1109_v41, %v1086_v60 }
 0x290   :  { %1135 = vst.msk [vmem:[%s1860_s9 + $0x40] sm:$0xff] %vm1126_vm3, %v1118_v61 }
 0x295   :  { %v1089_v62 = vpop.xlane.xlu0 %1088 }
 0x296   :  { %v1119_v32 = vadd.f32 %v1109_v41, %v1089_v62 }
 0x298   :  { %1136 = vst.msk [vmem:[%s1860_s9 + $0x48] sm:$0xff] %vm1126_vm3, %v1119_v32 }
 0x29d   :  { %v1092_v63 = vpop.xlane.xlu1 %1091 }
 0x29e   :  { %v1120_v0 = vadd.f32 %v1109_v41, %v1092_v63 }
 0x2a0   :  { %1137 = vst.msk [vmem:[%s1860_s9 + $0x50] sm:$0xff] %vm1126_vm3, %v1120_v0 }
 0x2a5   :  { %v1095_v1 = vpop.xlane.xlu2 %1094 }
 0x2a6   :  { %v1121_v7 = vadd.f32 %v1109_v41, %v1095_v1 }
 0x2a8   :  { %1138 = vst.msk [vmem:[%s1860_s9 + $0x58] sm:$0xff] %vm1126_vm3, %v1121_v7 }
 0x2ad   :  { %v1098_v2 = vpop.xlane.xlu0 %1097 }
 0x2ae   :  { %v1122_v4 = vadd.f32 %v1109_v41, %v1098_v2 }
 0x2b0   :  { %1139 = vst.msk [vmem:[%s1860_s9 + $0x60] sm:$0xff] %vm1126_vm3, %v1122_v4 }
 0x2b5   :  { %v1101_v8 = vpop.xlane.xlu1 %1100 }
 0x2b6   :  { %v1123_v9 = vadd.f32 %v1109_v41, %v1101_v8 }
 0x2b8   :  { %1140 = vst.msk [vmem:[%s1860_s9 + $0x68] sm:$0xff] %vm1126_vm3, %v1123_v9 }
 0x2bd   :  { %v1104_v10 = vpop.xlane.xlu2 %1103 }
 0x2be   :  { %v1124_v11 = vadd.f32 %v1109_v41, %v1104_v10 }
 0x2c0   :  { %1141 = vst.msk [vmem:[%s1860_s9 + $0x70] sm:$0xff] %vm1126_vm3, %v1124_v11 }
 0x2c5   :  { %v1107_v12 = vpop.xlane.xlu0 %1106 }
 0x2c6   :  { %v1125_v13 = vadd.f32 %v1109_v41, %v1107_v12 }
 0x2c8   :  { %1142 = vst.msk [vmem:[%s1860_s9 + $0x78] sm:$0xff] %vm1126_vm3, %v1125_v13 }
 0x2c9   :  { %1147 = vsyncpa [#allocation4], 1 }

</bundles_post_ra>
